<compile_context>
chip_gen: v5e
topology: v5e:2x2
jax: 0.10.0
libtpu: 0.0.40
codegen_flags: <defaults>
</compile_context>

<pallas_src>
import functools

import jax
import jax.numpy as jnp
from jax.experimental import pallas as pl
from jax.experimental.pallas import tpu as pltpu


def lstm_t0_fc_kernel(x_ref, wg_ref, wfc_ref, bfc_ref, out_ref):
    """Single LSTM step from zero state + final fc, fully fused.

    x_ref   : [TB, I+1]   first-timestep inputs + ones column (bias fold)
    wg_ref  : [I+1, 3H]   packed gate weights (i|g|o) with bias row appended
    wfc_ref : [H, OP]     fc weight (W_fc^T), zero-padded to OP=128 lanes
    bfc_ref : [1, OP]     fc bias, zero-padded
    out_ref : [TB, OP]
    """
    h_size = wfc_ref.shape[0]
    # One fused MXU dot for all three gates (bias already folded in).
    z = jnp.dot(x_ref[...], wg_ref[...], preferred_element_type=jnp.float32)
    i_s = jax.nn.sigmoid(z[:, 0 * h_size:1 * h_size])
    g_t = jnp.tanh(z[:, 1 * h_size:2 * h_size])
    o_s = jax.nn.sigmoid(z[:, 2 * h_size:3 * h_size])
    c = i_s * g_t                 # forget gate * c0 == 0, dropped
    h = o_s * jnp.tanh(c)         # == out[:, 0, :] of the full LSTM
    # Dropout (eval mode) is identity; final fc (lane-dense output).
    out_ref[...] = (
        jnp.dot(h, wfc_ref[...], preferred_element_type=jnp.float32) + bfc_ref[...])


def pack_params(params):
    """One-time weight prep (hoisted out of the hot path)."""
    w_ih = jnp.asarray(params["w_ih"], jnp.float32)   # [4H, I]
    w_hh = jnp.asarray(params["w_hh"], jnp.float32)   # [4H, H]
    b_ih = jnp.asarray(params["b_ih"], jnp.float32)   # [4H]
    b_hh = jnp.asarray(params["b_hh"], jnp.float32)   # [4H]
    w_fc = jnp.asarray(params["w_fc"], jnp.float32)   # [O, H]
    b_fc = jnp.asarray(params["b_fc"], jnp.float32)   # [O]

    H = w_hh.shape[1]
    O = w_fc.shape[0]
    b_comb = b_ih + b_hh                               # [4H]

    # PyTorch gate order i | f | g | o.  Forget gate (k=1) unused: c0 == 0.
    gate_idx = (0, 2, 3)
    w_g = jnp.concatenate(
        [jnp.transpose(w_ih[k * H:(k + 1) * H, :]) for k in gate_idx], axis=1)   # [I, 3H]
    b_g = jnp.concatenate(
        [b_comb[k * H:(k + 1) * H] for k in gate_idx]).reshape(1, 3 * H)         # [1, 3H]
    w_gates_aug = jnp.concatenate([w_g, b_g], axis=0)                            # [I+1, 3H]

    # Lane-dense fc: pad output dim to a multiple of 128.
    OP = max(128, ((O + 127) // 128) * 128)
    w_fc_pad = jnp.zeros((H, OP), jnp.float32).at[:, :O].set(jnp.transpose(w_fc))
    b_fc_pad = jnp.zeros((1, OP), jnp.float32).at[0, :O].set(b_fc)

    return {
        "w_gates_aug": jax.device_put(w_gates_aug),
        "w_fc_pad": jax.device_put(w_fc_pad),
        "b_fc_pad": jax.device_put(b_fc_pad),
        "o_size": int(O),
    }


@functools.partial(jax.jit, static_argnums=(4,))
def _lstm_forward_jit(x, w_gates_aug, w_fc_pad, b_fc_pad, o_size):
    """Hot path: x0 extraction/padding + one pallas_call."""
    B, _, I = x.shape
    H, OP = w_fc_pad.shape
    threeH = w_gates_aug.shape[1]

    # Pad batch to the f32 sublane multiple (8); choose a batch tile so large
    # batches get a parallel grid axis (megacore on v7x), toy batches get grid=(1,).
    B8 = max(8, ((B + 7) // 8) * 8)
    TB = min(B8, 256)
    B_pad = ((B8 + TB - 1) // TB) * TB

    # Only x[:, 0, :] matters; append a ones column so the gate bias is folded
    # into the single packed matmul.
    x0 = x[:, 0, :].astype(jnp.float32)                                   # [B, I]
    x0_aug = jnp.zeros((B_pad, I + 1), jnp.float32)
    x0_aug = x0_aug.at[:B, :I].set(x0)
    x0_aug = x0_aug.at[:, I].set(1.0)

    out_p = pl.pallas_call(
        lstm_t0_fc_kernel,
        out_shape=jax.ShapeDtypeStruct((B_pad, OP), jnp.float32),
        grid=(B_pad // TB,),
        in_specs=[
            pl.BlockSpec((TB, I + 1), lambda b: (b, 0)),
            pl.BlockSpec((I + 1, threeH), lambda b: (0, 0)),
            pl.BlockSpec((H, OP), lambda b: (0, 0)),
            pl.BlockSpec((1, OP), lambda b: (0, 0)),
        ],
        out_specs=pl.BlockSpec((TB, OP), lambda b: (b, 0)),
        compiler_params=pltpu.CompilerParams(dimension_semantics=("parallel",)),
    )(x0_aug, w_gates_aug, w_fc_pad, b_fc_pad)

    return out_p[:B, :o_size]


def lstm_model_forward(x, packed):
    """x: [B, T, I] (batch_first, like PyTorch). Returns [B, O]."""
    return _lstm_forward_jit(x, packed["w_gates_aug"], packed["w_fc_pad"],
                             packed["b_fc_pad"], packed["o_size"])


def _reference_forward(x, params):
    """Pure-JAX reference mirroring the PyTorch module (eval mode): runs the
    FULL recurrence and takes out[:, 0, :], validating the kernel's
    algebraic simplification."""
    w_ih, w_hh, b_ih, b_hh, w_fc, b_fc = (
        params["w_ih"], params["w_hh"], params["b_ih"], params["b_hh"],
        params["w_fc"], params["b_fc"],
    )
    B, T, _ = x.shape
    H = w_hh.shape[1]
    h = jnp.zeros((B, H), jnp.float32)
    c = jnp.zeros((B, H), jnp.float32)
    outs = []
    for t in range(T):
        g = x[:, t, :] @ w_ih.T + b_ih + h @ w_hh.T + b_hh
        i_g = jax.nn.sigmoid(g[:, 0 * H:1 * H])
        f_g = jax.nn.sigmoid(g[:, 1 * H:2 * H])
        g_g = jnp.tanh(g[:, 2 * H:3 * H])
        o_g = jax.nn.sigmoid(g[:, 3 * H:4 * H])
        c = f_g * c + i_g * g_g
        h = o_g * jnp.tanh(c)
        outs.append(h)
    out0 = outs[0]                      # out[:, 0, :]
    return out0 @ w_fc.T + b_fc


if __name__ == "__main__":
    # Small shapes consistent with the module's forward.
    batch, seq, input_size, hidden_size, output_size = 2, 8, 4, 32, 4

    key = jax.random.PRNGKey(0)
    kx, k1, k2, k3, k4, k5, k6 = jax.random.split(key, 7)

    scale = 1.0 / jnp.sqrt(hidden_size)
    params = {
        "w_ih": jax.random.uniform(k1, (4 * hidden_size, input_size),
                                   minval=-scale, maxval=scale, dtype=jnp.float32),
        "w_hh": jax.random.uniform(k2, (4 * hidden_size, hidden_size),
                                   minval=-scale, maxval=scale, dtype=jnp.float32),
        "b_ih": jax.random.uniform(k3, (4 * hidden_size,),
                                   minval=-scale, maxval=scale, dtype=jnp.float32),
        "b_hh": jax.random.uniform(k4, (4 * hidden_size,),
                                   minval=-scale, maxval=scale, dtype=jnp.float32),
        "w_fc": jax.random.uniform(k5, (output_size, hidden_size),
                                   minval=-scale, maxval=scale, dtype=jnp.float32),
        "b_fc": jax.random.uniform(k6, (output_size,),
                                   minval=-scale, maxval=scale, dtype=jnp.float32),
    }

    x = jax.random.normal(kx, (batch, seq, input_size), dtype=jnp.float32)

    packed = pack_params(params)        # one-time weight prep (cached)
    out = jax.block_until_ready(lstm_model_forward(x, packed))
    ref = jax.block_until_ready(_reference_forward(x, params))

    assert out.shape == (batch, output_size), out.shape
    assert jnp.allclose(out, ref, atol=1e-5, rtol=1e-5), (out, ref)
    print("KERNEL_OK")
</pallas_src>

<mosaic_0001>
module attributes {stable_mosaic.version = 11 : i64} {
  func.func @lstm_t0_fc_kernel(%arg0: i32, %arg1: memref<8x5xf32, #tpu.memory_space<vmem>>, %arg2: memref<5x96xf32, #tpu.memory_space<vmem>>, %arg3: memref<32x128xf32, #tpu.memory_space<vmem>>, %arg4: memref<1x128xf32, #tpu.memory_space<vmem>>, %arg5: memref<8x128xf32, #tpu.memory_space<vmem>>) attributes {dimension_semantics = [#tpu.dimension_semantics<parallel>], iteration_bounds = array<i64: 1>, scalar_prefetch = 0 : i64, scratch_operands = 0 : i64, tpu.core_type = #tpu.core_type<tc>, window_params = [{transform_indices = @transform_0, window_bounds = array<i64: 8, 5>}, {pipeline_mode = #tpu.pipeline_mode<synchronous>, transform_indices = @transform_1, window_bounds = array<i64: 5, 96>}, {pipeline_mode = #tpu.pipeline_mode<synchronous>, transform_indices = @transform_2, window_bounds = array<i64: 32, 128>}, {pipeline_mode = #tpu.pipeline_mode<synchronous>, transform_indices = @transform_3, window_bounds = array<i64: 1, 128>}, {transform_indices = @transform_4, window_bounds = array<i64: 8, 128>}]} {
    %c0 = arith.constant 0 : index
    %c0_0 = arith.constant 0 : index
    %0 = vector.load %arg1[%c0, %c0_0] : memref<8x5xf32, #tpu.memory_space<vmem>>, vector<8x5xf32>
    %c0_1 = arith.constant 0 : index
    %c0_2 = arith.constant 0 : index
    %1 = vector.load %arg2[%c0_1, %c0_2] : memref<5x96xf32, #tpu.memory_space<vmem>>, vector<5x96xf32>
    %cst = arith.constant dense<0.000000e+00> : vector<8x96xf32>
    %2 = tpu.matmul %0, %1, %cst {dimension_numbers = #tpu.dot_dimension_numbers<[1], [0], [0], [1], [0, 0, 1, 1], [], []>} : vector<8x5xf32>, vector<5x96xf32>, vector<8x96xf32> -> vector<8x96xf32>
    %3 = vector.extract_strided_slice %2 {offsets = [0, 0], sizes = [8, 32], strides = [1, 1]} : vector<8x96xf32> to vector<8x32xf32>
    %4 = arith.negf %3 : vector<8x32xf32>
    %5 = math.exp %4 : vector<8x32xf32>
    %cst_3 = arith.constant 1.000000e+00 : f32
    %6 = vector.broadcast %cst_3 : f32 to vector<8x32xf32>
    %7 = arith.addf %6, %5 : vector<8x32xf32>
    %8 = arith.divf %6, %7 : vector<8x32xf32>
    %9 = vector.extract_strided_slice %2 {offsets = [0, 32], sizes = [8, 32], strides = [1, 1]} : vector<8x96xf32> to vector<8x32xf32>
    %10 = math.tanh %9 : vector<8x32xf32>
    %11 = vector.extract_strided_slice %2 {offsets = [0, 64], sizes = [8, 32], strides = [1, 1]} : vector<8x96xf32> to vector<8x32xf32>
    %12 = arith.negf %11 : vector<8x32xf32>
    %13 = math.exp %12 : vector<8x32xf32>
    %cst_4 = arith.constant 1.000000e+00 : f32
    %14 = vector.broadcast %cst_4 : f32 to vector<8x32xf32>
    %15 = arith.addf %14, %13 : vector<8x32xf32>
    %16 = arith.divf %14, %15 : vector<8x32xf32>
    %17 = arith.mulf %8, %10 : vector<8x32xf32>
    %18 = math.tanh %17 : vector<8x32xf32>
    %19 = arith.mulf %16, %18 : vector<8x32xf32>
    %c0_5 = arith.constant 0 : index
    %c0_6 = arith.constant 0 : index
    %20 = vector.load %arg3[%c0_5, %c0_6] : memref<32x128xf32, #tpu.memory_space<vmem>>, vector<32x128xf32>
    %cst_7 = arith.constant dense<0.000000e+00> : vector<8x128xf32>
    %21 = tpu.matmul %19, %20, %cst_7 {dimension_numbers = #tpu.dot_dimension_numbers<[1], [0], [0], [1], [0, 0, 1, 1], [], []>} : vector<8x32xf32>, vector<32x128xf32>, vector<8x128xf32> -> vector<8x128xf32>
    %c0_8 = arith.constant 0 : index
    %c0_9 = arith.constant 0 : index
    %22 = vector.load %arg4[%c0_8, %c0_9] : memref<1x128xf32, #tpu.memory_space<vmem>>, vector<1x128xf32>
    %23 = vector.broadcast %22 : vector<1x128xf32> to vector<8x128xf32>
    %24 = arith.addf %21, %23 : vector<8x128xf32>
    %c0_10 = arith.constant 0 : index
    %c0_11 = arith.constant 0 : index
    %25 = vector.load %arg5[%c0_10, %c0_11] : memref<8x128xf32, #tpu.memory_space<vmem>>, vector<8x128xf32>
    tpu.vector_store %arg5[%c0_10, %c0_11], %24 {strides = array<i32>} : memref<8x128xf32, #tpu.memory_space<vmem>>, vector<8x128xf32>,
    return
  }
  func.func @transform_0(%arg0: i32) -> (i32, i32) {
    %c0_i32 = arith.constant 0 : i32
    %c0_i32_0 = arith.constant 0 : i32
    return %arg0, %c0_i32 : i32, i32
  }
  func.func @transform_1(%arg0: i32) -> (i32, i32) {
    %c0_i32 = arith.constant 0 : i32
    %c0_i32_0 = arith.constant 0 : i32
    %c0_i32_1 = arith.constant 0 : i32
    return %c0_i32, %c0_i32_0 : i32, i32
  }
  func.func @transform_2(%arg0: i32) -> (i32, i32) {
    %c0_i32 = arith.constant 0 : i32
    %c0_i32_0 = arith.constant 0 : i32
    %c0_i32_1 = arith.constant 0 : i32
    return %c0_i32, %c0_i32_0 : i32, i32
  }
  func.func @transform_3(%arg0: i32) -> (i32, i32) {
    %c0_i32 = arith.constant 0 : i32
    %c0_i32_0 = arith.constant 0 : i32
    %c0_i32_1 = arith.constant 0 : i32
    return %c0_i32, %c0_i32_0 : i32, i32
  }
  func.func @transform_4(%arg0: i32) -> (i32, i32) {
    %c0_i32 = arith.constant 0 : i32
    %c0_i32_0 = arith.constant 0 : i32
    return %arg0, %c0_i32 : i32, i32
  }
}

</mosaic_0001>

<bundles_post_ra>
// kernel: _lstm_forward_jit.1
= control target key start
LH: loop header
LB: loop body
LE: loop exit
PB: predicated region body
PF: predicated region fallthrough
CT: control target
= control target key end

     0   :  { %vm23_vm0 = vcmask 1044480   ;;  %vm19_vm1 = vcmask 39936   ;;  %s132_s19 = smov 96   ;;  %vm89_vm6 = vcmask 261120   ;;  %s183_s1 = inlined_call_operand.vmem [shape: f32[5,96], index: 1, kind: input, shape index: {}]   ;;  %s184_s0 = inlined_call_operand.vmem [shape: f32[8,5], index: 0, kind: input, shape index: {}]   ;;  %s185_s2 = inlined_call_operand.vmem [shape: f32[32,128], index: 2, kind: input, shape index: {}]   ;;  %s186_s3 = inlined_call_operand.vmem [shape: f32[1,128], index: 3, kind: input, shape index: {}]   ;;  %s187_s4 = inlined_call_operand.vmem [shape: f32[8,128], index: 4, kind: output, shape index: {}]  }
   0x1   :  { %v18_v0 = vld [vmem:[%s183_s1] sm:$0x1f]  ;;  %v81_v20 = vld [vmem:[%s185_s2 + $0x18] sm:$0xff]  ;;  %v80_v21 = vld [vmem:[%s185_s2 + $0x10] sm:$0xff] }
   0x2   :  { %v17_v1 = vld [vmem:[%s184_s0] sm:$0xff]  ;;  %117 = vmatpush.msk.msra.mxu0 %vm23_vm0, %v18_v0  ;;  %s133_s0 = smov 64   ;;  %104 = vmatpush.msra.mxu1 %v81_v20  ;;  %v79_v22 = vld [vmem:[%s185_s2 + $0x8] sm:$0xff] }
   0x3   :  { %118 = vmatmul.msk.f32.vlgmr.msra.gmra.mxu0 %vm19_vm1, %v17_v1  ;;  %v78_v23 = vld [vmem:[%s185_s2] sm:$0xff] }
   0x4   :  { %105 = vmatpush.msra.mxu1 %v80_v21  ;;  %v123_v27 = vld [vmem:[%s186_s3] ss:$0 sm:$0xff] }
   0x6   :  { %106 = vmatpush.msra.mxu1 %v79_v22 }
   0x8   :  { %107 = vmatpush.msra.mxu1 %v78_v23 }
  0x80   :  { %v44_v2 = vpop.f32.mrf.mxu0 }
  0x81   :  { %124 = vtanh.f32 %v44_v2  ;;  %v119_v4 = vmul.f32 -1.442695, %v44_v2 }
  0x83   :  { %126 = vpow2.f32 %v119_v4 }
  0x87   :  { %v125_v3 = vpop.eup %124 }
  0x88   :  { %68 = vrot.lane.b32.xlu0 %v125_v3, %s132_s19 }
  0x89   :  { %v127_v5 = vpop.eup %126 }
  0x8a   :  { %v50_v6 = vadd.f32 1.0, %v127_v5 }
  0x8c   :  { %128 = vrcp.f32 %v50_v6  ;;  %v62_v12 = vand.u32 2147483648, %v50_v6  ;;  %vm56_vm3 = vweird.f32 %v50_v6  ;;  %v60_v13 = vand.u32 2147483647, %v50_v6 }
  0x8e   :  { %v63_v15 = vor.u32 1.1754944e-38, %v62_v12  ;;  %vm61_vm5 = vcmp.eq.f32.partialorder %v60_v13, 8.507059e+37 }
  0x92   :  { %v129_v7 = vpop.eup %128 }
  0x93   :  { %v52_v8 = vmul.f32 %v129_v7, %v50_v6  ;;  %vm57_vm2 = vweird.f32 %v129_v7 }
  0x94   :  { %vm58_vm4 = vmor %vm56_vm3, %vm57_vm2 }
  0x95   :  { %v53_v9 = vsub.f32 1.0, %v52_v8 }
  0x97   :  { %v54_v10 = vmul.f32 %v129_v7, %v53_v9 }
  0x99   :  { %v55_v11 = vadd.f32 %v129_v7, %v54_v10 }
  0x9b   :  { %v59_v14 = vsel %vm58_vm4, %v129_v7, %v55_v11 }
  0x9c   :  { %v64_v17 = vsel %vm61_vm5, %v63_v15, %v59_v14 }
  0xfa   :  { %v69_v16 = vpop.permute.xlu0 %68 }
  0xfb   :  { %v71_v18 = vmul.f32 %v69_v16, %v64_v17 }
  0xfd   :  { %130 = vtanh.f32 %v71_v18 }
 0x103   :  { %v131_v19 = vpop.eup %130 }
 0x104   :  { %74 = vrot.lane.b32.xlu0 %v131_v19, %s133_s0 }
 0x176   :  { %v75_v24 = vpop.permute.xlu0 %74 }
 0x177   :  { %v77_v25 = vmul.f32 %v75_v24, %v64_v17 }
 0x179   :  { %87 = vrot.lane.b32.xlu1 %v77_v25, %s133_s0 }
 0x1eb   :  { %v88_v26 = vpop.permute.xlu1 %87 }
 0x1ec   :  { %120 = vmatmul.msk.f32.vlgmr.msra.gmra.mxu1 %vm89_vm6, %v88_v26 }
 0x269   :  { %v109_v28 = vpop.f32.mrf.mxu1 }
 0x26a   :  { %v110_v29 = vadd.f32 %v123_v27, %v109_v28 }
 0x26c   :  { %112 = vst [vmem:[%s187_s4] sm:$0xff] %v110_v29 }

</bundles_post_ra>
